<compile_context>
chip_gen: v5e
topology: v5e:2x2
jax: 0.10.0
libtpu: 0.0.40
codegen_flags: <defaults>
</compile_context>

<pallas_src>
import functools

import jax
import jax.numpy as jnp
import numpy as np
from jax.experimental import pallas as pl
from jax.experimental.pallas import tpu as pltpu

_LANE = 128      # TPU lane width (last-dim tiling unit)
_SUBLANE = 8     # sublane count for 32-bit layouts


def _outconv_kernel(x_ref, w_ref, b_ref, o_ref, *, bn):
    # x_ref : (Bn, Cin, T)   Bn batch rows, one lane-dense spatial tile
    # w_ref : (Cout, Cin)    weights (compute dtype)
    # b_ref : (Cout, 1)      bias, f32
    # o_ref : (Bn, Cout, T)  output tile (lane-dense stores)
    w = w_ref[...]
    b = b_ref[...]
    for i in range(bn):                       # static unroll; bn is small
        x = x_ref[i]
        if x.dtype != w.dtype:                # opt-in bf16: cast right before the dot
            x = x.astype(w.dtype)
        # Single MXU matmul with f32 accumulation.  (For Cin<=16/Cout<=8 a VPU
        # broadcast-FMA path would shave the MXU latency, but the kernel is
        # DMA-bound so it would not change wall clock.)
        acc = jnp.dot(w, x, preferred_element_type=jnp.float32)
        o_ref[i] = (acc + b).astype(o_ref.dtype)          # fused bias add (VPU)


def _vmem_capacity_bytes():
    """Physical VMEM per TensorCore (128 MiB on v5e/v6e, 64 MiB on v7x)."""
    try:
        cap = int(pltpu.get_tpu_info().vmem_capacity_bytes)
        if cap > 0:
            return cap
    except Exception:
        pass
    return 64 * 1024 * 1024   # conservative fallback (v7x-sized)


def _pad_sublanes(c, itemsize):
    """VMEM second-to-last-dim padding: 8 sublanes for 32-bit dtypes,
    16 for 16-bit, 32 for 8-bit."""
    mult = _SUBLANE * max(1, 4 // int(itemsize))
    return pl.cdiv(max(int(c), 1), mult) * mult


def _choose_tiling(n, hw, cin, cout, in_itemsize, out_itemsize, vmem_capacity):
    """Pick (batch rows per grid step, spatial lanes per grid step).

    Double-buffered in+out blocks are kept under 3/8 of VMEM capacity
    (~24 MiB on v7x, ~48 MiB on v5e/v6e); within that budget the tile grows as
    large as possible (tile width is the dominant lever for HBM utilisation),
    and small images block several batch rows per step to amortise the
    ~0.35 us per-grid-step overhead.
    """
    tile_budget = (vmem_capacity * 3) // 8
    cin_p = _pad_sublanes(cin, in_itemsize)
    cout_p = _pad_sublanes(cout, out_itemsize)
    bytes_per_col = 2 * (cin_p * in_itemsize + cout_p * out_itemsize)   # 2x = dbl buffer
    max_cols = max(_LANE, (tile_budget // bytes_per_col) // _LANE * _LANE)

    if hw > max_cols:
        # Large images: one batch row per step, lane-dense spatial tiles.
        return 1, int(max_cols)

    # Small images: the whole spatial extent fits in one (full-extent) block.
    tile_hw = hw
    bn = min(max(1, max_cols // max(hw, 1)), n)
    if n > 1:
        # Keep >=2 grid steps so the "parallel" axes can be split across
        # v7x's two TensorCores.
        bn = min(bn, pl.cdiv(n, 2))
    elif hw >= 2 * _LANE:
        # Single batch element: split the spatial axis instead (128-multiples).
        tile_hw = pl.cdiv(pl.cdiv(hw, 2), _LANE) * _LANE
    return int(bn), int(tile_hw)


def out_conv_forward(x_nchw, params, *, compute_dtype=None, out_dtype=None):
    """Forward of OutConv (Conv2d kernel_size=1).  Input/output NCHW.

    compute_dtype: optional MXU operand dtype (e.g. jnp.bfloat16).  Default
        None keeps the input dtype (matches PyTorch f32 exactly).  Activations
        are never cast in the wrapper; any cast happens in-kernel right before
        the dot, so HBM traffic is unchanged.
    out_dtype: optional output storage dtype.  Default None keeps the input
        dtype; bf16 halves output HBM writes (f32 accumulation is kept either
        way, cast only at the store) — biggest relative win on v5e.
    """
    N, Cin, H, W = x_nchw.shape
    w = params["w"].reshape(params["w"].shape[0], Cin)     # (Cout,Cin,1,1)->(Cout,Cin)
    Cout = w.shape[0]

    in_dtype = x_nchw.dtype
    cdt = in_dtype if compute_dtype is None else jnp.dtype(compute_dtype)
    odt = in_dtype if out_dtype is None else jnp.dtype(out_dtype)

    w = w.astype(cdt)                                      # tiny; no HBM concern
    b = params["b"].reshape(Cout, 1).astype(jnp.float32)

    HW = H * W
    x = x_nchw.reshape(N, Cin, HW)                         # free contiguous reshape

    vmem_cap = _vmem_capacity_bytes()
    bn, tile_hw = _choose_tiling(N, HW, Cin, Cout,
                                 jnp.dtype(in_dtype).itemsize,
                                 jnp.dtype(odt).itemsize,
                                 vmem_cap)
    grid = (pl.cdiv(N, bn), pl.cdiv(HW, tile_hw))

    out = pl.pallas_call(
        functools.partial(_outconv_kernel, bn=bn),
        out_shape=jax.ShapeDtypeStruct((N, Cout, HW), odt),
        grid=grid,
        in_specs=[
            pl.BlockSpec((bn, Cin, tile_hw), lambda n, t: (n, 0, t)),
            pl.BlockSpec((Cout, Cin), lambda n, t: (0, 0)),
            pl.BlockSpec((Cout, 1), lambda n, t: (0, 0)),
        ],
        out_specs=pl.BlockSpec((bn, Cout, tile_hw), lambda n, t: (n, 0, t)),
        compiler_params=pltpu.CompilerParams(
            dimension_semantics=("parallel", "parallel"),   # megacore-friendly on v7x
            vmem_limit_bytes=int((vmem_cap * 3) // 4)),     # 48 MiB v7x / 96 MiB v5e,v6e
    )(x, w, b)

    return out.reshape(N, Cout, H, W)                      # free contiguous reshape


def init_out_conv_params(key, in_channels, out_channels):
    """PyTorch Conv2d default init: U(-1/sqrt(fan_in), 1/sqrt(fan_in)), fan_in=Cin*1*1."""
    kw, kb = jax.random.split(key)
    bound = 1.0 / float(np.sqrt(in_channels))
    w = jax.random.uniform(kw, (out_channels, in_channels, 1, 1), jnp.float32,
                           -bound, bound)
    b = jax.random.uniform(kb, (out_channels,), jnp.float32, -bound, bound)
    return {"w": w, "b": b}


# ---------------- pure-JAX reference (for correctness check) -----------------
def out_conv_ref(x_nchw, params):
    w = params["w"][:, :, 0, 0]                                   # (Cout, Cin)
    y = jnp.einsum("nchw,oc->nohw", x_nchw, w,
                   precision=jax.lax.Precision.HIGHEST)
    return y + params["b"][None, :, None, None]


if __name__ == "__main__":
    key = jax.random.PRNGKey(0)
    kx, kp = jax.random.split(key)

    N, Cin, H, W = 2, 4, 16, 16
    Cout = 8
    x = jax.random.normal(kx, (N, Cin, H, W), jnp.float32)
    params = init_out_conv_params(kp, Cin, Cout)

    # Default path: f32 operands / f32 output (matches PyTorch semantics).
    fwd = jax.jit(out_conv_forward)
    # Opt-in fast path: bf16 operands (cast in-kernel) + bf16 output.
    fwd_fast = jax.jit(functools.partial(out_conv_forward,
                                         compute_dtype=jnp.bfloat16,
                                         out_dtype=jnp.bfloat16))

    out = jax.block_until_ready(fwd(x, params))
    out_fast = jax.block_until_ready(fwd_fast(x, params))
    ref = jax.block_until_ready(out_conv_ref(x, params))

    assert out.shape == (N, Cout, H, W), out.shape
    assert out.dtype == jnp.float32, out.dtype
    assert out_fast.shape == (N, Cout, H, W), out_fast.shape
    assert out_fast.dtype == jnp.bfloat16, out_fast.dtype

    # Exact-semantics default path: tight check against HIGHEST-precision ref.
    np.testing.assert_allclose(np.asarray(out), np.asarray(ref),
                               rtol=1e-3, atol=1e-3)
    # Opt-in bf16 path: operand/output rounding dominates; f32 accumulation
    # keeps it within loose tolerance.
    np.testing.assert_allclose(np.asarray(out_fast, dtype=np.float32),
                               np.asarray(ref), rtol=2e-2, atol=5e-2)
    print("KERNEL_OK")
</pallas_src>

<mosaic_0001>
module attributes {stable_mosaic.version = 11 : i64} {
  func.func @_outconv_kernel(%arg0: i32, %arg1: i32, %arg2: memref<1x4x256xf32, #tpu.memory_space<vmem>>, %arg3: memref<8x4xf32, #tpu.memory_space<vmem>>, %arg4: memref<8x1xf32, #tpu.memory_space<vmem>>, %arg5: memref<1x8x256xf32, #tpu.memory_space<vmem>>) attributes {dimension_semantics = [#tpu.dimension_semantics<parallel>, #tpu.dimension_semantics<parallel>], iteration_bounds = array<i64: 2, 1>, scalar_prefetch = 0 : i64, scratch_operands = 0 : i64, tpu.core_type = #tpu.core_type<tc>, window_params = [{transform_indices = @transform_0, window_bounds = array<i64: 1, 4, 256>}, {pipeline_mode = #tpu.pipeline_mode<synchronous>, transform_indices = @transform_1, window_bounds = array<i64: 8, 4>}, {pipeline_mode = #tpu.pipeline_mode<synchronous>, transform_indices = @transform_2, window_bounds = array<i64: 8, 1>}, {transform_indices = @transform_3, window_bounds = array<i64: 1, 8, 256>}]} {
    %c0 = arith.constant 0 : index
    %c0_0 = arith.constant 0 : index
    %0 = vector.load %arg3[%c0, %c0_0] : memref<8x4xf32, #tpu.memory_space<vmem>>, vector<8x4xf32>
    %c0_1 = arith.constant 0 : index
    %c0_2 = arith.constant 0 : index
    %1 = vector.load %arg4[%c0_1, %c0_2] : memref<8x1xf32, #tpu.memory_space<vmem>>, vector<8x1xf32>
    %c0_3 = arith.constant 0 : index
    %c0_4 = arith.constant 0 : index
    %c0_5 = arith.constant 0 : index
    %2 = vector.load %arg2[%c0_3, %c0_4, %c0_5] : memref<1x4x256xf32, #tpu.memory_space<vmem>>, vector<1x4x256xf32>
    %3 = vector.shape_cast %2 : vector<1x4x256xf32> to vector<4x256xf32>
    %cst = arith.constant dense<0.000000e+00> : vector<8x256xf32>
    %4 = tpu.matmul %0, %3, %cst {dimension_numbers = #tpu.dot_dimension_numbers<[1], [0], [0], [1], [0, 0, 1, 1], [], []>} : vector<8x4xf32>, vector<4x256xf32>, vector<8x256xf32> -> vector<8x256xf32>
    %5 = vector.broadcast %1 : vector<8x1xf32> to vector<8x256xf32>
    %6 = arith.addf %4, %5 : vector<8x256xf32>
    %c0_6 = arith.constant 0 : index
    %c0_7 = arith.constant 0 : index
    %c0_8 = arith.constant 0 : index
    %7 = vector.load %arg5[%c0_6, %c0_7, %c0_8] : memref<1x8x256xf32, #tpu.memory_space<vmem>>, vector<1x8x256xf32>
    %8 = vector.shape_cast %7 : vector<1x8x256xf32> to vector<8x256xf32>
    %9 = vector.shape_cast %6 : vector<8x256xf32> to vector<1x8x256xf32>
    tpu.vector_store %arg5[%c0_6, %c0_7, %c0_8], %9 {strides = array<i32>} : memref<1x8x256xf32, #tpu.memory_space<vmem>>, vector<1x8x256xf32>,
    return
  }
  func.func @transform_0(%arg0: i32, %arg1: i32) -> (i32, i32, i32) {
    %c0_i32 = arith.constant 0 : i32
    %c0_i32_0 = arith.constant 0 : i32
    return %arg0, %c0_i32, %arg1 : i32, i32, i32
  }
  func.func @transform_1(%arg0: i32, %arg1: i32) -> (i32, i32) {
    %c0_i32 = arith.constant 0 : i32
    %c0_i32_0 = arith.constant 0 : i32
    %c0_i32_1 = arith.constant 0 : i32
    return %c0_i32, %c0_i32_0 : i32, i32
  }
  func.func @transform_2(%arg0: i32, %arg1: i32) -> (i32, i32) {
    %c0_i32 = arith.constant 0 : i32
    %c0_i32_0 = arith.constant 0 : i32
    %c0_i32_1 = arith.constant 0 : i32
    return %c0_i32, %c0_i32_0 : i32, i32
  }
  func.func @transform_3(%arg0: i32, %arg1: i32) -> (i32, i32, i32) {
    %c0_i32 = arith.constant 0 : i32
    %c0_i32_0 = arith.constant 0 : i32
    return %arg0, %c0_i32, %arg1 : i32, i32, i32
  }
}

</mosaic_0001>

<bundles_post_ra>
// kernel: out_conv_forward.1
= control target key start
LH: loop header
LB: loop body
LE: loop exit
PB: predicated region body
PF: predicated region fallthrough
CT: control target
= control target key end

     0   :  { %s448_s12 = smov 0   ;;  %s450_s13 = smov 0   ;;  %s487_s0 = inlined_call_operand.vmem [shape: f32[2,4,256], index: 0, kind: input, shape index: {}]   ;;  %s488_s1 = inlined_call_operand.vmem [shape: f32[8,4], index: 1, kind: input, shape index: {}]   ;;  %s489_s2 = inlined_call_operand.vmem [shape: f32[8,1], index: 2, kind: input, shape index: {}]   ;;  %s490_s3 = inlined_call_operand.vmem [shape: f32[2,8,256], index: 3, kind: output, shape index: {}]  }
   0x1   :  { %s452_s14 = smov 0  }
   0x2 LB: > { %s25_s15 = sadd.s32 1, %s421_s13  ;;  %p364_p0 = scmp.ge.s32.totalorder %s425_s14, 1  ;;  %s425_s14 = sphi %s452_s14, %s13_s14   ;;  %s421_s13 = sphi %s450_s13, %s492_s13   ;;  %s417_s12 = sphi %s448_s12, %s491_s12  }
   0x3   : > { %p27_p1 = scmp.ge.s32.totalorder %s25_s15, 2  ;;  %p158_p2 = scmp.lt.s32.totalorder %s425_s14, 3 }
   0x5   : > { %s494_s15 = smov (%p27_p1, %s25_s15), 0  ;;  %p159_p3 = pnand %p364_p0, %p158_p2 }
   0x6   : > { %p191_p4 = scmp.lt.s32.totalorder (!%p159_p3), %s417_s12, 1 }
   0x7   : > { %162 = sbr.rel (%p159_p3) target bundleno = 155 (0x9b), region = 32 }
   0xc   : > { %v211_v0 = vld [vmem:[%s489_s2] sm:$0xff]  ;;  %v427_v1 = vmov 0   ;;  %s496_s12 = smov (!%p191_p4, %s417_s12), 1  ;;  %vm226_vm0 = vcmask 1043456   ;;  %vm222_vm1 = vcmask 31744  }
   0xd   : > { %402 = vset.pattern.permute.xlu0 %v427_v1  ;;  %s375_s18 = sshll.u32 %s496_s12, 3  ;;  %v210_v3 = vld [vmem:[%s488_s1] sm:$0xff]  ;;  %s376_s24 = sshll.u32 %s496_s12, 4 }
   0xe   : > { %215 = vperm.xlu0 %402, %v211_v0   ;;  %s198_s21 = scalar_lea.vmem %s487_s0, %s375_s18  ;;  %s208_s27 = scalar_lea.vmem %s490_s3, %s376_s24 }
   0xf   : > { %v212_v2 = vld [vmem:[%s198_s21] sm:$0xff] }
  0x10   : > { %219 = vst [vmem:[#allocation1] ss:$2 sm:$0xff] %v212_v2 }
  0x17   : > { %v220_v4 = vld.sshfl [vmem:[#allocation1] sm:$0xff pattern:$0x75316420]  ;;  %v221_v5 = vld.sshfl [vmem:[#allocation1 + $0x8] sm:$0xff pattern:$0x75316420] }
  0x18   : > { %369 = vmatpush.msk.msra.mxu0 %vm226_vm0, %v220_v4  ;;  %371 = vmatpush.msk.msra.mxu1 %vm226_vm0, %v221_v5 }
  0x19   : > { %370 = vmatmul.msk.f32.vlgmr.msra.gmra.mxu0 %vm222_vm1, %v210_v3  ;;  %372 = vmatmul.msk.f32.vlgmr.msra.gmra.mxu1 %vm222_vm1, %v210_v3 }
  0x80   : > { %v216_v6 = vpop.permute.xlu0 %215 }
  0x96   : > { %v248_v7 = vpop.f32.mrf.mxu0  ;;  %v268_v8 = vpop.f32.mrf.mxu1 }
  0x97   : > { %v249_v9 = vadd.f32 %v248_v7, %v216_v6  ;;  %v269_v10 = vadd.f32 %v268_v8, %v216_v6 }
  0x99   : > { %271 = vst [vmem:[%s208_s27] sm:$0xff] %v249_v9 }
  0x9a   : > { %272 = vst [vmem:[%s208_s27 + $0x8] sm:$0xff] %v269_v10 }
  0x9b PF: > { %s13_s14 = sadd.s32 1, %s425_s14   ;;  %s491_s12 = smov %s421_s13 }
  0x9c   : > { %p10_p5 = scmp.ge.s32.totalorder %s13_s14, 4   ;;  %s492_s13 = smov %s494_s15 }
  0x9e   :  { %12 = sbr.rel (!%p10_p5) target bundleno = 2 (0x2), region = 62 }

</bundles_post_ra>
